<compile_context>
chip_gen: v7x
topology: tpu7x:2x2x1
jax: 0.10.0
libtpu: 0.0.40
codegen_flags: <defaults>
</compile_context>

<pallas_src>
import jax
import jax.numpy as jnp
from jax.experimental import pallas as pl
from jax.experimental.pallas import tpu as pltpu


def gatnet_kernel(x_ref, bias1_ref, bias2_ref, diag_sel_ref, eye_ref,
                  w1_ref, w1d_ref, w1s_ref, b1_ref,
                  sum_sel_ref, bdmask_ref, rep_ref,
                  w2_ref, w2d_ref, w2s_ref, b2_ref,
                  wfc_ref, bfc_ref, out_ref):
    f32 = jnp.float32
    x = x_ref[...]                                                      # [N, F_in]

    # ---------- conv1: GATConv(F_in, f1, heads=H, concat=True) --------------
    # Three independent matmuls off x (no dependent MXU chain):
    xw1 = jnp.dot(x, w1_ref[...], preferred_element_type=f32)          # [N, H*f1] values
    dst1 = jnp.dot(x, w1d_ref[...], preferred_element_type=f32)        # [N, H*N]  dst logits, head-packed
    src1 = jnp.dot(x, w1s_ref[...], preferred_element_type=f32)        # [N, H*N]  src logits, spread
    # src_row[0, h*N + j] = src_logit[j, h]  (diag select + sublane reduce)
    src_row1 = jnp.sum(src1 * diag_sel_ref[...], axis=0, keepdims=True)  # [1, H*N]

    e1 = dst1 + src_row1                               # e[i, h*N+j] = a_dst[i,h] + a_src[j,h]
    e1 = jnp.where(e1 >= 0, e1, 0.2 * e1)              # LeakyReLU(0.2)
    e1 = e1 + bias1_ref[...]                           # additive adjacency mask (0 / -1e30)
    m1 = jnp.max(e1, axis=1, keepdims=True)            # global row max is a valid per-head shift
    p1 = jnp.exp(e1 - m1)                              # masked entries underflow to exactly 0

    denom1 = jnp.dot(p1, sum_sel_ref[...], preferred_element_type=f32)   # [N, H] per-head sums
    inv1 = pl.reciprocal(jnp.maximum(denom1, 1e-30), approx=True)        # EUP; guard is 1 tiny VPU op

    reps = bdmask_ref.shape[0] // xw1.shape[0]                           # = H (static)
    vals1 = jnp.concatenate([xw1] * reps, axis=0) * bdmask_ref[...]      # block-diag values [H*N, H*f1]
    agg1 = jnp.dot(p1, vals1, preferred_element_type=f32)                # [N, H*f1], K = H*N = 128
    norm1 = jnp.dot(inv1, rep_ref[...], preferred_element_type=f32)      # 1/denom spread to f1 blocks
    h1 = jnp.maximum(agg1 * norm1 + b1_ref[...], 0.0)                    # bias + ReLU (Dropout = identity)

    # ---------- conv2: GATConv(H*f1, f2, heads=1, concat=False) -------------
    xw2 = jnp.dot(h1, w2_ref[...], preferred_element_type=f32)           # [N, f2]
    dst2 = jnp.dot(h1, w2d_ref[...], preferred_element_type=f32)         # [N, N]
    src2 = jnp.dot(h1, w2s_ref[...], preferred_element_type=f32)         # [N, N]
    src_row2 = jnp.sum(src2 * eye_ref[...], axis=0, keepdims=True)       # [1, N]

    e2 = dst2 + src_row2
    e2 = jnp.where(e2 >= 0, e2, 0.2 * e2)
    e2 = e2 + bias2_ref[...]
    m2 = jnp.max(e2, axis=1, keepdims=True)
    p2 = jnp.exp(e2 - m2)
    denom2 = jnp.sum(p2, axis=1, keepdims=True)                          # [N, 1]
    inv2 = pl.reciprocal(jnp.maximum(denom2, 1e-30), approx=True)
    h2 = jnp.dot(p2, xw2, preferred_element_type=f32) * inv2 + b2_ref[...]   # [N, f2]

    # ---------- fc: Linear(f2, 2) — lane-dense padded output ----------------
    out = jnp.dot(h2, wfc_ref[...], preferred_element_type=f32) + bfc_ref[...]
    out_ref[...] = out.astype(out_ref.dtype)


_VMEM = pl.BlockSpec(memory_space=pltpu.MemorySpace.VMEM)
_OUT_PAD = 128     # lane-dense output slab; wrapper slices [:, :2]


def gatnet_forward(x, adj, params, *, heads, hidden_channels, out_channels):
    n, _ = x.shape
    h, f1, f2 = heads, hidden_channels, out_channels
    f32 = jnp.float32

    # ---- wrapper-side constant folding (runs once, outside the kernel) ----
    eye_h = jnp.eye(h, dtype=f32)
    eye_n = jnp.eye(n, dtype=f32)
    r_dst = jnp.kron(eye_h, jnp.ones((1, n), f32))          # [H, H*N]  head -> packed spread
    diag_sel = jnp.kron(jnp.ones((1, h), f32), eye_n)        # [N, H*N]  within-block diagonal
    sum_sel = jnp.kron(eye_h, jnp.ones((n, 1), f32))         # [H*N, H]  per-head block sums
    bdmask = jnp.kron(eye_h, jnp.ones((n, f1), f32))         # [H*N, H*f1] block-diag value mask
    rep_f1 = jnp.kron(eye_h, jnp.ones((1, f1), f32))         # [H, H*f1] 1/denom broadcast

    def _bd_cols(att):  # [H, f1] -> [H*f1, H] block-diagonal attention columns
        return (att[:, :, None] * eye_h[:, None, :]).reshape(h * f1, h)

    w1 = params["w1"].astype(f32)
    w1d = w1 @ _bd_cols(params["att_dst1"]) @ r_dst          # [F_in, H*N]
    w1s = w1 @ _bd_cols(params["att_src1"]) @ r_dst          # [F_in, H*N]
    w2 = params["w2"].astype(f32)
    ones_row = jnp.ones((1, n), f32)
    w2d = w2 @ params["att_dst2"].T @ ones_row                # [H*f1, N]
    w2s = w2 @ params["att_src2"].T @ ones_row                # [H*f1, N]

    bias2 = jnp.where(adj > 0, jnp.float32(0.0), jnp.float32(-1e30))   # [N, N]
    bias1 = jnp.tile(bias2, (1, h))                                    # [N, H*N] head-major

    ncls = params["w_fc"].shape[1]
    wfc = jnp.zeros((f2, _OUT_PAD), f32).at[:, :ncls].set(params["w_fc"])
    bfc = jnp.zeros((1, _OUT_PAD), f32).at[:, :ncls].set(params["b_fc"])

    out = pl.pallas_call(
        gatnet_kernel,
        out_shape=jax.ShapeDtypeStruct((n, _OUT_PAD), f32),
        in_specs=[_VMEM] * 18,
        out_specs=_VMEM,
    )(x, bias1, bias2, diag_sel, eye_n,
      w1, w1d, w1s, params["bias1"],
      sum_sel, bdmask, rep_f1,
      w2, w2d, w2s, params["bias2"],
      wfc, bfc)
    return out[:, :ncls]


# ------------------------- pure-JAX reference -------------------------------
def _gat_layer_ref(x, w, att_src, att_dst, bias, mask, heads, f_out, concat):
    xw = x @ w
    outs = []
    for hh in range(heads):
        xw_h = xw[:, hh * f_out:(hh + 1) * f_out]
        a_s = jnp.sum(xw_h * att_src[hh], axis=-1)
        a_d = jnp.sum(xw_h * att_dst[hh], axis=-1)
        e = a_d[:, None] + a_s[None, :]
        e = jnp.where(e >= 0, e, 0.2 * e)
        e = jnp.where(mask, e, -jnp.inf)
        alpha = jax.nn.softmax(e, axis=1)
        outs.append(alpha @ xw_h)
    out = jnp.concatenate(outs, -1) if concat else sum(outs) / heads
    return out + bias


def gatnet_reference(x, mask, params, *, heads, hidden_channels, out_channels):
    h = _gat_layer_ref(x, params["w1"], params["att_src1"], params["att_dst1"],
                       params["bias1"], mask, heads, hidden_channels, True)
    h = jnp.maximum(h, 0.0)
    h = _gat_layer_ref(h, params["w2"], params["att_src2"], params["att_dst2"],
                       params["bias2"], mask, 1, out_channels, False)
    return h @ params["w_fc"] + params["b_fc"]


if __name__ == "__main__":
    key = jax.random.PRNGKey(0)
    N, E = 16, 48
    in_channels, hidden_channels, out_channels, heads = 16, 8, 16, 8

    ks = jax.random.split(key, 13)

    # ----- graph inputs (data.x, data.edge_index) -----
    x = jax.random.normal(ks[0], (N, in_channels), jnp.float32)
    src = jax.random.randint(ks[1], (E,), 0, N)
    dst = jax.random.randint(ks[2], (E,), 0, N)
    edge_index = jnp.stack([src, dst])  # [2, E], row0 = source, row1 = target

    # dense adjacency mask with self-loops (PyG add_self_loops=True default)
    adj = jnp.zeros((N, N), jnp.float32).at[dst, src].set(1.0)
    adj = jnp.maximum(adj, jnp.eye(N, dtype=jnp.float32))

    # ----- deterministic parameter init (shapes from GATNet.__init__) -----
    s = 0.1
    params = {
        # conv1: GATConv(in_channels, hidden_channels, heads=8, concat=True)
        "w1": s * jax.random.normal(ks[3], (in_channels, heads * hidden_channels), jnp.float32),
        "att_src1": s * jax.random.normal(ks[4], (heads, hidden_channels), jnp.float32),
        "att_dst1": s * jax.random.normal(ks[5], (heads, hidden_channels), jnp.float32),
        "bias1": s * jax.random.normal(ks[6], (1, heads * hidden_channels), jnp.float32),
        # conv2: GATConv(hidden*heads, out_channels, heads=1, concat=False)
        "w2": s * jax.random.normal(ks[7], (heads * hidden_channels, out_channels), jnp.float32),
        "att_src2": s * jax.random.normal(ks[8], (1, out_channels), jnp.float32),
        "att_dst2": s * jax.random.normal(ks[9], (1, out_channels), jnp.float32),
        "bias2": s * jax.random.normal(ks[10], (1, out_channels), jnp.float32),
        # fc: Linear(out_channels, 2)
        "w_fc": s * jax.random.normal(ks[11], (out_channels, 2), jnp.float32),
        "b_fc": s * jax.random.normal(ks[12], (1, 2), jnp.float32),
    }

    logits = gatnet_forward(x, adj, params, heads=heads,
                            hidden_channels=hidden_channels,
                            out_channels=out_channels)
    jax.block_until_ready(logits)
    assert logits.shape == (N, 2) and logits.dtype == jnp.float32

    ref = gatnet_reference(x, adj > 0, params, heads=heads,
                           hidden_channels=hidden_channels,
                           out_channels=out_channels)
    assert bool(jnp.all(jnp.isfinite(logits)))
    assert bool(jnp.allclose(logits, ref, atol=1e-2, rtol=1e-2)), \
        f"max abs err {jnp.max(jnp.abs(logits - ref))}"
    print("KERNEL_OK")
</pallas_src>

<mosaic_0001>
module attributes {stable_mosaic.version = 11 : i64} {
  func.func @gatnet_kernel(%arg0: memref<16x16xf32, #tpu.memory_space<vmem>>, %arg1: memref<16x128xf32, #tpu.memory_space<vmem>>, %arg2: memref<16x16xf32, #tpu.memory_space<vmem>>, %arg3: memref<16x128xf32, #tpu.memory_space<vmem>>, %arg4: memref<16x16xf32, #tpu.memory_space<vmem>>, %arg5: memref<16x64xf32, #tpu.memory_space<vmem>>, %arg6: memref<16x128xf32, #tpu.memory_space<vmem>>, %arg7: memref<16x128xf32, #tpu.memory_space<vmem>>, %arg8: memref<1x64xf32, #tpu.memory_space<vmem>>, %arg9: memref<128x8xf32, #tpu.memory_space<vmem>>, %arg10: memref<128x64xf32, #tpu.memory_space<vmem>>, %arg11: memref<8x64xf32, #tpu.memory_space<vmem>>, %arg12: memref<64x16xf32, #tpu.memory_space<vmem>>, %arg13: memref<64x16xf32, #tpu.memory_space<vmem>>, %arg14: memref<64x16xf32, #tpu.memory_space<vmem>>, %arg15: memref<1x16xf32, #tpu.memory_space<vmem>>, %arg16: memref<16x128xf32, #tpu.memory_space<vmem>>, %arg17: memref<1x128xf32, #tpu.memory_space<vmem>>, %arg18: memref<16x128xf32, #tpu.memory_space<vmem>>) attributes {dimension_semantics = [], scalar_prefetch = 0 : i64, scratch_operands = 0 : i64, tpu.core_type = #tpu.core_type<tc>} {
    %c0 = arith.constant 0 : index
    %c0_0 = arith.constant 0 : index
    %0 = vector.load %arg0[%c0, %c0_0] : memref<16x16xf32, #tpu.memory_space<vmem>>, vector<16x16xf32>
    %c0_1 = arith.constant 0 : index
    %c0_2 = arith.constant 0 : index
    %1 = vector.load %arg5[%c0_1, %c0_2] : memref<16x64xf32, #tpu.memory_space<vmem>>, vector<16x64xf32>
    %cst = arith.constant dense<0.000000e+00> : vector<16x64xf32>
    %2 = tpu.matmul %0, %1, %cst {dimension_numbers = #tpu.dot_dimension_numbers<[1], [0], [0], [1], [0, 0, 1, 1], [], []>} : vector<16x16xf32>, vector<16x64xf32>, vector<16x64xf32> -> vector<16x64xf32>
    %c0_3 = arith.constant 0 : index
    %c0_4 = arith.constant 0 : index
    %3 = vector.load %arg6[%c0_3, %c0_4] : memref<16x128xf32, #tpu.memory_space<vmem>>, vector<16x128xf32>
    %cst_5 = arith.constant dense<0.000000e+00> : vector<16x128xf32>
    %4 = tpu.matmul %0, %3, %cst_5 {dimension_numbers = #tpu.dot_dimension_numbers<[1], [0], [0], [1], [0, 0, 1, 1], [], []>} : vector<16x16xf32>, vector<16x128xf32>, vector<16x128xf32> -> vector<16x128xf32>
    %c0_6 = arith.constant 0 : index
    %c0_7 = arith.constant 0 : index
    %5 = vector.load %arg7[%c0_6, %c0_7] : memref<16x128xf32, #tpu.memory_space<vmem>>, vector<16x128xf32>
    %cst_8 = arith.constant dense<0.000000e+00> : vector<16x128xf32>
    %6 = tpu.matmul %0, %5, %cst_8 {dimension_numbers = #tpu.dot_dimension_numbers<[1], [0], [0], [1], [0, 0, 1, 1], [], []>} : vector<16x16xf32>, vector<16x128xf32>, vector<16x128xf32> -> vector<16x128xf32>
    %c0_9 = arith.constant 0 : index
    %c0_10 = arith.constant 0 : index
    %7 = vector.load %arg3[%c0_9, %c0_10] : memref<16x128xf32, #tpu.memory_space<vmem>>, vector<16x128xf32>
    %8 = arith.mulf %6, %7 : vector<16x128xf32>
    %cst_11 = arith.constant dense<0.000000e+00> : vector<128xf32>
    %9 = vector.multi_reduction <add>, %8, %cst_11 [0] : vector<16x128xf32> to vector<128xf32>
    %10 = vector.shape_cast %9 : vector<128xf32> to vector<1x128xf32>
    %11 = vector.broadcast %10 : vector<1x128xf32> to vector<16x128xf32>
    %12 = arith.addf %4, %11 : vector<16x128xf32>
    %cst_12 = arith.constant 0.000000e+00 : f32
    %13 = vector.broadcast %cst_12 : f32 to vector<16x128xf32>
    %14 = arith.cmpf oge, %12, %13 : vector<16x128xf32>
    %cst_13 = arith.constant 2.000000e-01 : f32
    %15 = vector.broadcast %cst_13 : f32 to vector<16x128xf32>
    %16 = arith.mulf %15, %12 : vector<16x128xf32>
    %17 = arith.select %14, %12, %16 : vector<16x128xi1>, vector<16x128xf32>
    %c0_14 = arith.constant 0 : index
    %c0_15 = arith.constant 0 : index
    %18 = vector.load %arg1[%c0_14, %c0_15] : memref<16x128xf32, #tpu.memory_space<vmem>>, vector<16x128xf32>
    %19 = arith.addf %17, %18 : vector<16x128xf32>
    %cst_16 = arith.constant dense<0xFF800000> : vector<16xf32>
    %20 = vector.multi_reduction <maximumf>, %19, %cst_16 [1] : vector<16x128xf32> to vector<16xf32>
    %21 = vector.shape_cast %20 : vector<16xf32> to vector<16x1xf32>
    %22 = vector.broadcast %21 : vector<16x1xf32> to vector<16x128xf32>
    %23 = arith.subf %19, %22 : vector<16x128xf32>
    %24 = math.exp %23 : vector<16x128xf32>
    %c0_17 = arith.constant 0 : index
    %c0_18 = arith.constant 0 : index
    %25 = vector.load %arg9[%c0_17, %c0_18] : memref<128x8xf32, #tpu.memory_space<vmem>>, vector<128x8xf32>
    %cst_19 = arith.constant dense<0.000000e+00> : vector<16x8xf32>
    %26 = tpu.matmul %24, %25, %cst_19 {dimension_numbers = #tpu.dot_dimension_numbers<[1], [0], [0], [1], [0, 0, 1, 1], [], []>} : vector<16x128xf32>, vector<128x8xf32>, vector<16x8xf32> -> vector<16x8xf32>
    %cst_20 = arith.constant 1.000000e-30 : f32
    %27 = vector.broadcast %cst_20 : f32 to vector<16x8xf32>
    %28 = arith.maximumf %26, %27 : vector<16x8xf32>
    %29 = tpu.reciprocal %28 {approx = true} : vector<16x8xf32> -> vector<16x8xf32>
    %30 = tpu.concatenate %2, %2, %2, %2, %2, %2, %2, %2 in 0 : vector<16x64xf32>, vector<16x64xf32>, vector<16x64xf32>, vector<16x64xf32>, vector<16x64xf32>, vector<16x64xf32>, vector<16x64xf32>, vector<16x64xf32> -> vector<128x64xf32>
    %c0_21 = arith.constant 0 : index
    %c0_22 = arith.constant 0 : index
    %31 = vector.load %arg10[%c0_21, %c0_22] : memref<128x64xf32, #tpu.memory_space<vmem>>, vector<128x64xf32>
    %32 = arith.mulf %30, %31 : vector<128x64xf32>
    %cst_23 = arith.constant dense<0.000000e+00> : vector<16x64xf32>
    %33 = tpu.matmul %24, %32, %cst_23 {dimension_numbers = #tpu.dot_dimension_numbers<[1], [0], [0], [1], [0, 0, 1, 1], [], []>} : vector<16x128xf32>, vector<128x64xf32>, vector<16x64xf32> -> vector<16x64xf32>
    %c0_24 = arith.constant 0 : index
    %c0_25 = arith.constant 0 : index
    %34 = vector.load %arg11[%c0_24, %c0_25] : memref<8x64xf32, #tpu.memory_space<vmem>>, vector<8x64xf32>
    %cst_26 = arith.constant dense<0.000000e+00> : vector<16x64xf32>
    %35 = tpu.matmul %29, %34, %cst_26 {dimension_numbers = #tpu.dot_dimension_numbers<[1], [0], [0], [1], [0, 0, 1, 1], [], []>} : vector<16x8xf32>, vector<8x64xf32>, vector<16x64xf32> -> vector<16x64xf32>
    %36 = arith.mulf %33, %35 : vector<16x64xf32>
    %c0_27 = arith.constant 0 : index
    %c0_28 = arith.constant 0 : index
    %37 = vector.load %arg8[%c0_27, %c0_28] : memref<1x64xf32, #tpu.memory_space<vmem>>, vector<1x64xf32>
    %38 = vector.broadcast %37 : vector<1x64xf32> to vector<16x64xf32>
    %39 = arith.addf %36, %38 : vector<16x64xf32>
    %cst_29 = arith.constant 0.000000e+00 : f32
    %40 = vector.broadcast %cst_29 : f32 to vector<16x64xf32>
    %41 = arith.maximumf %39, %40 : vector<16x64xf32>
    %c0_30 = arith.constant 0 : index
    %c0_31 = arith.constant 0 : index
    %42 = vector.load %arg12[%c0_30, %c0_31] : memref<64x16xf32, #tpu.memory_space<vmem>>, vector<64x16xf32>
    %cst_32 = arith.constant dense<0.000000e+00> : vector<16x16xf32>
    %43 = tpu.matmul %41, %42, %cst_32 {dimension_numbers = #tpu.dot_dimension_numbers<[1], [0], [0], [1], [0, 0, 1, 1], [], []>} : vector<16x64xf32>, vector<64x16xf32>, vector<16x16xf32> -> vector<16x16xf32>
    %c0_33 = arith.constant 0 : index
    %c0_34 = arith.constant 0 : index
    %44 = vector.load %arg13[%c0_33, %c0_34] : memref<64x16xf32, #tpu.memory_space<vmem>>, vector<64x16xf32>
    %cst_35 = arith.constant dense<0.000000e+00> : vector<16x16xf32>
    %45 = tpu.matmul %41, %44, %cst_35 {dimension_numbers = #tpu.dot_dimension_numbers<[1], [0], [0], [1], [0, 0, 1, 1], [], []>} : vector<16x64xf32>, vector<64x16xf32>, vector<16x16xf32> -> vector<16x16xf32>
    %c0_36 = arith.constant 0 : index
    %c0_37 = arith.constant 0 : index
    %46 = vector.load %arg14[%c0_36, %c0_37] : memref<64x16xf32, #tpu.memory_space<vmem>>, vector<64x16xf32>
    %cst_38 = arith.constant dense<0.000000e+00> : vector<16x16xf32>
    %47 = tpu.matmul %41, %46, %cst_38 {dimension_numbers = #tpu.dot_dimension_numbers<[1], [0], [0], [1], [0, 0, 1, 1], [], []>} : vector<16x64xf32>, vector<64x16xf32>, vector<16x16xf32> -> vector<16x16xf32>
    %c0_39 = arith.constant 0 : index
    %c0_40 = arith.constant 0 : index
    %48 = vector.load %arg4[%c0_39, %c0_40] : memref<16x16xf32, #tpu.memory_space<vmem>>, vector<16x16xf32>
    %49 = arith.mulf %47, %48 : vector<16x16xf32>
    %cst_41 = arith.constant dense<0.000000e+00> : vector<16xf32>
    %50 = vector.multi_reduction <add>, %49, %cst_41 [0] : vector<16x16xf32> to vector<16xf32>
    %51 = vector.shape_cast %50 : vector<16xf32> to vector<1x16xf32>
    %52 = vector.broadcast %51 : vector<1x16xf32> to vector<16x16xf32>
    %53 = arith.addf %45, %52 : vector<16x16xf32>
    %cst_42 = arith.constant 0.000000e+00 : f32
    %54 = vector.broadcast %cst_42 : f32 to vector<16x16xf32>
    %55 = arith.cmpf oge, %53, %54 : vector<16x16xf32>
    %cst_43 = arith.constant 2.000000e-01 : f32
    %56 = vector.broadcast %cst_43 : f32 to vector<16x16xf32>
    %57 = arith.mulf %56, %53 : vector<16x16xf32>
    %58 = arith.select %55, %53, %57 : vector<16x16xi1>, vector<16x16xf32>
    %c0_44 = arith.constant 0 : index
    %c0_45 = arith.constant 0 : index
    %59 = vector.load %arg2[%c0_44, %c0_45] : memref<16x16xf32, #tpu.memory_space<vmem>>, vector<16x16xf32>
    %60 = arith.addf %58, %59 : vector<16x16xf32>
    %cst_46 = arith.constant dense<0xFF800000> : vector<16xf32>
    %61 = vector.multi_reduction <maximumf>, %60, %cst_46 [1] : vector<16x16xf32> to vector<16xf32>
    %62 = vector.shape_cast %61 : vector<16xf32> to vector<16x1xf32>
    %63 = vector.broadcast %62 : vector<16x1xf32> to vector<16x16xf32>
    %64 = arith.subf %60, %63 : vector<16x16xf32>
    %65 = math.exp %64 : vector<16x16xf32>
    %cst_47 = arith.constant dense<0.000000e+00> : vector<16xf32>
    %66 = vector.multi_reduction <add>, %65, %cst_47 [1] : vector<16x16xf32> to vector<16xf32>
    %67 = vector.shape_cast %66 : vector<16xf32> to vector<16x1xf32>
    %cst_48 = arith.constant 1.000000e-30 : f32
    %68 = vector.broadcast %cst_48 : f32 to vector<16x1xf32>
    %69 = arith.maximumf %67, %68 : vector<16x1xf32>
    %70 = tpu.reciprocal %69 {approx = true} : vector<16x1xf32> -> vector<16x1xf32>
    %cst_49 = arith.constant dense<0.000000e+00> : vector<16x16xf32>
    %71 = tpu.matmul %65, %43, %cst_49 {dimension_numbers = #tpu.dot_dimension_numbers<[1], [0], [0], [1], [0, 0, 1, 1], [], []>} : vector<16x16xf32>, vector<16x16xf32>, vector<16x16xf32> -> vector<16x16xf32>
    %72 = vector.broadcast %70 : vector<16x1xf32> to vector<16x16xf32>
    %73 = arith.mulf %71, %72 : vector<16x16xf32>
    %c0_50 = arith.constant 0 : index
    %c0_51 = arith.constant 0 : index
    %74 = vector.load %arg15[%c0_50, %c0_51] : memref<1x16xf32, #tpu.memory_space<vmem>>, vector<1x16xf32>
    %75 = vector.broadcast %74 : vector<1x16xf32> to vector<16x16xf32>
    %76 = arith.addf %73, %75 : vector<16x16xf32>
    %c0_52 = arith.constant 0 : index
    %c0_53 = arith.constant 0 : index
    %77 = vector.load %arg16[%c0_52, %c0_53] : memref<16x128xf32, #tpu.memory_space<vmem>>, vector<16x128xf32>
    %cst_54 = arith.constant dense<0.000000e+00> : vector<16x128xf32>
    %78 = tpu.matmul %76, %77, %cst_54 {dimension_numbers = #tpu.dot_dimension_numbers<[1], [0], [0], [1], [0, 0, 1, 1], [], []>} : vector<16x16xf32>, vector<16x128xf32>, vector<16x128xf32> -> vector<16x128xf32>
    %c0_55 = arith.constant 0 : index
    %c0_56 = arith.constant 0 : index
    %79 = vector.load %arg17[%c0_55, %c0_56] : memref<1x128xf32, #tpu.memory_space<vmem>>, vector<1x128xf32>
    %80 = vector.broadcast %79 : vector<1x128xf32> to vector<16x128xf32>
    %81 = arith.addf %78, %80 : vector<16x128xf32>
    %c0_57 = arith.constant 0 : index
    %c0_58 = arith.constant 0 : index
    %82 = vector.load %arg18[%c0_57, %c0_58] : memref<16x128xf32, #tpu.memory_space<vmem>>, vector<16x128xf32>
    tpu.vector_store %arg18[%c0_57, %c0_58], %81 {strides = array<i32>} : memref<16x128xf32, #tpu.memory_space<vmem>>, vector<16x128xf32>,
    return
  }
}

</mosaic_0001>

<bundles_post_ra>
// kernel: tpu_custom_call.1
= control target key start
LH: loop header
LB: loop body
LE: loop exit
PB: predicated region body
PF: predicated region fallthrough
CT: control target
= control target key end

     0   :  { %s1948_s0 = inlined_call_operand.vmem [shape: f32[16,16], index: 0, kind: input, shape index: {}]   ;;  %s1949_s1 = inlined_call_operand.vmem [shape: f32[16,128], index: 1, kind: input, shape index: {}]   ;;  %s1950_s2 = inlined_call_operand.vmem [shape: f32[16,16], index: 2, kind: input, shape index: {}]   ;;  %s1951_s3 = inlined_call_operand.vmem [shape: f32[16,128], index: 3, kind: input, shape index: {}]   ;;  %s1952_s4 = inlined_call_operand.vmem [shape: f32[16,16], index: 4, kind: input, shape index: {}]   ;;  %s1953_s5 = inlined_call_operand.vmem [shape: f32[16,64], index: 5, kind: input, shape index: {}]   ;;  %s1954_s6 = inlined_call_operand.vmem [shape: f32[16,128], index: 6, kind: input, shape index: {}]   ;;  %s1955_s7 = inlined_call_operand.vmem [shape: f32[16,128], index: 7, kind: input, shape index: {}]   ;;  %s1956_s8 = inlined_call_operand.vmem [shape: f32[1,64], index: 8, kind: input, shape index: {}]   ;;  %s1957_s9 = inlined_call_operand.vmem [shape: f32[128,8], index: 9, kind: input, shape index: {}]   ;;  %s1958_s10 = inlined_call_operand.vmem [shape: f32[128,64], index: 10, kind: input, shape index: {}]   ;;  %s1959_s11 = inlined_call_operand.vmem [shape: f32[8,64], index: 11, kind: input, shape index: {}]   ;;  %s1960_s12 = inlined_call_operand.vmem [shape: f32[64,16], index: 12, kind: input, shape index: {}]   ;;  %s1961_s13 = inlined_call_operand.vmem [shape: f32[64,16], index: 13, kind: input, shape index: {}]   ;;  %s1962_s14 = inlined_call_operand.vmem [shape: f32[64,16], index: 14, kind: input, shape index: {}]   ;;  %s1963_s15 = inlined_call_operand.vmem [shape: f32[1,16], index: 15, kind: input, shape index: {}]   ;;  %s1964_s16 = inlined_call_operand.vmem [shape: f32[16,128], index: 16, kind: input, shape index: {}]   ;;  %s1965_s17 = inlined_call_operand.vmem [shape: f32[1,128], index: 17, kind: input, shape index: {}]   ;;  %s1966_s18 = inlined_call_operand.hbm [shape: f32[16,128], index: 18, kind: output, shape index: {}]  }
   0x1   :  { %1970 = sst [smem:[#allocation5_spill]] %s1948_s0 }
   0x2   :  { %1971 = sst [smem:[#allocation6_spill]] %s1949_s1 }
   0x3   :  { %1972 = sst [smem:[#allocation7_spill]] %s1950_s2 }
   0x4   :  { %v62_v0 = vld [vmem:[%s1953_s5] sm:$0xff]  ;;  %v63_v1 = vld [vmem:[%s1953_s5 + $0x8] sm:$0xff]  ;;  %s1973_s1 = sld [smem:[#allocation5_spill]]  ;;  %vm64_vm0 = vcmask 130048  }
   0x5   :  { %v1407_v3 = vpack.c.bf16 %v63_v1, %v62_v0  ;;  %v148_v4 = vld [vmem:[%s1955_s7] sm:$0xff]  ;;  %v149_v5 = vld [vmem:[%s1955_s7 + $0x8] sm:$0xff] }
   0x6   :  { %v1411_v6 = vpack.c.bf16 %v149_v5, %v148_v4  ;;  %v146_v7 = vld [vmem:[%s1954_s6] sm:$0xff]  ;;  %v147_v8 = vld [vmem:[%s1954_s6 + $0x8] sm:$0xff] }
   0xa   :  { %v60_v2 = vld [vmem:[%s1973_s1] sm:$0xff] }
   0xb   :  { %1244 = vmatprep.mubr.msk.f32.mxu1 %vm64_vm0, %v60_v2  ;;  %1258 = vmatprep.mubr.msk.f32.mxu0 %vm64_vm0, %v60_v2 }
   0xc   :  { %23 = vsyncpa [#allocation3], 0  ;;  %1408 = vmatprep.subr.bf16.mxu1 %v1407_v3  ;;  %v1415_v9 = vpack.c.bf16 %v147_v8, %v146_v7  ;;  %v61_v10 = vld [vmem:[%s1973_s1 + $0x8] sm:$0xff]  ;;  %v331_v11 = vld [vmem:[%s1957_s9] sm:$0xff]  ;;  %s1974_s26 = sld [smem:[#allocation6_spill]]  ;;  %vm534_vm3 = vcmask 64512  }
   0xd   :  { %1410 = vmatpush3.bf16.msra.mxu1 %v1407_v3  ;;  %v332_v12 = vld [vmem:[%s1957_s9 + $0x8] sm:$0xff]  ;;  %v333_v13 = vld [vmem:[%s1957_s9 + $0x10] sm:$0xff]  ;;  %v334_v15 = vld [vmem:[%s1957_s9 + $0x18] sm:$0xff]  ;;  %vm637_vm4 = vcmask 523264   ;;  %s1975_s0 = sld [smem:[#allocation7_spill]]  ;;  %s1582_s5 = smov [#allocation2]  }
   0xe   :  { %1412 = vmatprep.subr.bf16.mxu1 %v1411_v6  ;;  %1416 = vmatprep.subr.bf16.mxu0 %v1415_v9  ;;  %v1419_v14 = vpack.c.bf16 %v332_v12, %v331_v11  ;;  %v1423_v16 = vpack.c.bf16 %v334_v15, %v333_v13  ;;  %v335_v17 = vld [vmem:[%s1957_s9 + $0x20] sm:$0xff]  ;;  %v336_v18 = vld [vmem:[%s1957_s9 + $0x28] sm:$0xff]  ;;  %v337_v20 = vld [vmem:[%s1957_s9 + $0x30] sm:$0xff]  ;;  %s1119_s23 = sshll.u32 %s1582_s5, 4  ;;  %s1120_s23 = int_to_ptr.vmem [resolvable:$true] %s1119_s23 }
   0xf   :  { %1418 = vmatpush3.bf16.msra.mxu0 %v1415_v9  ;;  %v1427_v19 = vpack.c.bf16 %v336_v18, %v335_v17  ;;  %v338_v21 = vld [vmem:[%s1957_s9 + $0x38] sm:$0xff]  ;;  %v427_v23 = vld [vmem:[%s1958_s10 + $0x8] sm:$0xff]  ;;  %v426_v26 = vld [vmem:[%s1958_s10] sm:$0xff]  ;;  %p1563_p1 = scmp.lt.s32.totalorder %s1120_s23, %s1120_s23 }
  0x10   :  { %1245 = vmatmul.mubr.msk.f32.vlgmr.msra.gmra.mrb[0].mxu1 %vm64_vm0, %v61_v10  ;;  %v1431_v22 = vpack.c.bf16 %v338_v21, %v337_v20  ;;  %v429_v24 = vld [vmem:[%s1958_s10 + $0x18] sm:$0xff]  ;;  %v431_v25 = vld [vmem:[%s1958_s10 + $0x28] sm:$0xff]  ;;  %v428_v27 = vld [vmem:[%s1958_s10 + $0x10] sm:$0xff] }
  0x11   :  { %1414 = vmatpush3.bf16.msra.mxu1 %v1411_v6  ;;  %1251 = vmatprep.mubr.msk.f32.mxu1 %vm64_vm0, %v60_v2  ;;  %v433_v28 = vld [vmem:[%s1958_s10 + $0x38] sm:$0xff]  ;;  %v430_v29 = vld [vmem:[%s1958_s10 + $0x20] sm:$0xff]  ;;  %v432_v30 = vld [vmem:[%s1958_s10 + $0x30] sm:$0xff] }
  0x12   :  { %1259 = vmatmul.mubr.msk.f32.vlgmr.msra.gmra.mrb[0].mxu0 %vm64_vm0, %v61_v10  ;;  %1420 = vmatprep.subr.bf16.mxu1 %v1419_v14  ;;  %v434_v31 = vld [vmem:[%s1958_s10 + $0x40] sm:$0xff]  ;;  %v435_v33 = vld [vmem:[%s1958_s10 + $0x48] sm:$0xff]  ;;  %v436_v34 = vld [vmem:[%s1958_s10 + $0x50] sm:$0xff] }
  0x13   :  { %v437_v35 = vld [vmem:[%s1958_s10 + $0x58] sm:$0xff]  ;;  %v226_v41 = vld [vmem:[%s1951_s3 + $0x8] sm:$0xff]  ;;  %v438_v47 = vld [vmem:[%s1958_s10 + $0x60] sm:$0xff] }
  0x14   :  { %1252 = vmatmul.mubr.msk.f32.vlgmr.msra.gmra.mrb[2].mxu1 %vm64_vm0, %v61_v10  ;;  %v439_v48 = vld [vmem:[%s1958_s10 + $0x68] sm:$0xff]  ;;  %v225_v49 = vld [vmem:[%s1951_s3] sm:$0xff]  ;;  %v440_v55 = vld [vmem:[%s1958_s10 + $0x70] sm:$0xff] }
  0x15   :  { %1422 = vmatpush3.bf16.msra.mxu1 %v1419_v14  ;;  %v441_v56 = vld [vmem:[%s1958_s10 + $0x78] sm:$0xff]  ;;  %v317_v20 = vld [vmem:[%s1974_s26] sm:$0xff] }
  0x16   :  { %1424 = vmatprep.subr.bf16.mxu1 %v1423_v16 }
  0x19   :  { %1426 = vmatpush3.bf16.msra.mxu1 %v1423_v16 }
  0x1a   :  { %1428 = vmatprep.subr.bf16.mxu1 %v1427_v19 }
  0x1d   :  { %1430 = vmatpush3.bf16.msra.mxu1 %v1427_v19 }
  0x1e   :  { %1432 = vmatprep.subr.bf16.mxu1 %v1431_v22 }
  0x21   :  { %1434 = vmatpush3.bf16.msra.mxu1 %v1431_v22 }
  0xe3   :  { %v1246_v32 = vpop.f32.mrb[0].mxu1 }
  0xe4   :  { %v137_v36 = vpop.f32.mrb[1].mxu1  ;;  %v443_v37 = vmul.f32 %v1246_v32, %v427_v23  ;;  %v445_v38 = vmul.f32 %v1246_v32, %v429_v24  ;;  %v447_v39 = vmul.f32 %v1246_v32, %v431_v25  ;;  %v449_v40 = vmul.f32 %v1246_v32, %v433_v28  ;;  %v318_v24 = vld [vmem:[%s1974_s26 + $0x8] sm:$0xff] }
  0xe5   :  { %v442_v42 = vmul.f32 %v426_v26, %v137_v36  ;;  %v444_v43 = vmul.f32 %v428_v27, %v137_v36  ;;  %v446_v44 = vmul.f32 %v430_v29, %v137_v36  ;;  %v448_v45 = vmul.f32 %v432_v30, %v137_v36  ;;  %v1260_v46 = vpop.f32.mrb[0].mxu0  ;;  %v339_v26 = vld [vmem:[%s1957_s9 + $0x40] sm:$0xff]  ;;  %v340_v27 = vld [vmem:[%s1957_s9 + $0x48] sm:$0xff]  ;;  %v341_v29 = vld [vmem:[%s1957_s9 + $0x50] sm:$0xff] }
  0xe6   :  { %v450_v50 = vmul.f32 %v434_v31, %v137_v36  ;;  %v451_v51 = vmul.f32 %v1246_v32, %v435_v33  ;;  %v302_v52 = vpop.f32.mrb[1].mxu0  ;;  %v452_v53 = vmul.f32 %v436_v34, %v137_v36  ;;  %v453_v54 = vmul.f32 %v1246_v32, %v437_v35  ;;  %v342_v30 = vld [vmem:[%s1957_s9 + $0x58] sm:$0xff]  ;;  %v343_v31 = vld [vmem:[%s1957_s9 + $0x60] sm:$0xff]  ;;  %v344_v33 = vld [vmem:[%s1957_s9 + $0x68] sm:$0xff] }
  0xe7   :  { %v1253_v57 = vpop.f32.mrb[2].mxu1  ;;  %v1451_v58 = vpack.c.bf16 %v443_v37, %v442_v42  ;;  %v1455_v59 = vpack.c.bf16 %v445_v38, %v444_v43  ;;  %v1459_v60 = vpack.c.bf16 %v447_v39, %v446_v44  ;;  %v1463_v61 = vpack.c.bf16 %v449_v40, %v448_v45  ;;  %v345_v35 = vld [vmem:[%s1957_s9 + $0x70] sm:$0xff] }
  0xe8   :  { %v228_v62 = vmul.f32 %v1253_v57, %v226_v41  ;;  %v216_v63 = vpop.f32.mrb[3].mxu1  ;;  %v1467_v0 = vpack.c.bf16 %v451_v51, %v450_v50  ;;  %v1471_v1 = vpack.c.bf16 %v453_v54, %v452_v53  ;;  %v454_v2 = vmul.f32 %v438_v47, %v137_v36  ;;  %v629_v47 = vld [vmem:[%s1960_s12] sm:$0xff]  ;;  %v728_v51 = vld [vmem:[%s1962_s14 + $0x8] sm:$0xff]  ;;  %v632_v53 = vld [vmem:[%s1960_s12 + $0x18] sm:$0xff] }
  0xe9   :  { %v227_v3 = vmul.f32 %v225_v49, %v216_v63  ;;  %1452 = vmatprep.subr.bf16.mxu0 %v1451_v58  ;;  %v455_v4 = vmul.f32 %v1246_v32, %v439_v48  ;;  %v456_v5 = vmul.f32 %v440_v55, %v137_v36  ;;  %v457_v6 = vmul.f32 %v1246_v32, %v441_v56  ;;  %v346_v36 = vld [vmem:[%s1957_s9 + $0x78] sm:$0xff]  ;;  %v630_v48 = vld [vmem:[%s1960_s12 + $0x8] sm:$0xff]  ;;  %v727_v49 = vld [vmem:[%s1962_s14] sm:$0xff] }
  0xea   :  { %1454 = vmatpush3.bf16.msra.mxu0 %v1451_v58  ;;  %v1435_v28 = vpack.c.bf16 %v340_v27, %v339_v26  ;;  %v1439_v32 = vpack.c.bf16 %v342_v30, %v341_v29  ;;  %v1443_v34 = vpack.c.bf16 %v344_v33, %v343_v31  ;;  %v1447_v37 = vpack.c.bf16 %v346_v36, %v345_v35  ;;  %v730_v63 = vld [vmem:[%s1962_s14 + $0x18] sm:$0xff]  ;;  %v723_v30 = vld [vmem:[%s1961_s13 + $0x20] sm:$0xff]  ;;  %v724_v31 = vld [vmem:[%s1961_s13 + $0x28] sm:$0xff] }
  0xeb   :  { %v229_v7 = vadd.f32 %v228_v62, %v227_v3  ;;  %1456 = vmatprep.subr.bf16.mxu0 %v1455_v59  ;;  %v1475_v8 = vpack.c.bf16 %v455_v4, %v454_v2  ;;  %v1479_v9 = vpack.c.bf16 %v457_v6, %v456_v5  ;;  %v1483_v50 = vpack.c.bf16 %v630_v48, %v629_v47  ;;  %v729_v62 = vld [vmem:[%s1962_s14 + $0x10] sm:$0xff]  ;;  %v633_v3 = vld [vmem:[%s1960_s12 + $0x20] sm:$0xff]  ;;  %v634_v4 = vld [vmem:[%s1960_s12 + $0x28] sm:$0xff] }
  0xec   :  { %1436 = vmatprep.subr.bf16.mxu1 %v1435_v28  ;;  %v1499_v54 = vpack.c.bf16 %v728_v51, %v727_v49  ;;  %v1491_v5 = vpack.c.bf16 %v634_v4, %v633_v3  ;;  %v731_v6 = vld [vmem:[%s1962_s14 + $0x20] sm:$0xff]  ;;  %v722_v26 = vld [vmem:[%s1961_s13 + $0x18] sm:$0xff]  ;;  %v725_v33 = vld [vmem:[%s1961_s13 + $0x30] sm:$0xff] }
  0xed   :  { %v230_v10 = vrot.slane %v229_v7, 4  ;;  %1438 = vmatpush3.bf16.msra.mxu1 %v1435_v28  ;;  %v811_v36 = vld [vmem:[%s1952_s4 + $0x8] sm:$0xff] }
  0xee   :  { %1458 = vmatpush3.bf16.msra.mxu0 %v1455_v59  ;;  %1440 = vmatprep.subr.bf16.mxu1 %v1439_v32 }
  0xef   :  { %v231_v11 = vadd.f32 %v230_v10, %v229_v7  ;;  %1460 = vmatprep.subr.bf16.mxu0 %v1459_v60  ;;  %v732_v7 = vld [vmem:[%s1962_s14 + $0x28] sm:$0xff]  ;;  %v636_v10 = vld [vmem:[%s1960_s12 + $0x38] sm:$0xff] }
  0xf1   :  { %v232_v12 = vrot.slane %v231_v11, 2  ;;  %1442 = vmatpush3.bf16.msra.mxu1 %v1439_v32  ;;  %v1523_v32 = vpack.c.bf16 %v724_v31, %v723_v30  ;;  %v1148_v30 = vld [vmem:[%s1965_s17] ss:$0 sm:$0xff] }
  0xf2   :  { %1462 = vmatpush3.bf16.msra.mxu0 %v1459_v60  ;;  %1444 = vmatprep.subr.bf16.mxu1 %v1443_v34 }
  0xf3   :  { %1464 = vmatprep.subr.bf16.mxu0 %v1463_v61  ;;  %v233_v13 = vadd.f32 %v232_v12, %v231_v11  ;;  %v733_v11 = vld [vmem:[%s1962_s14 + $0x30] sm:$0xff] }
  0xf5   :  { %v234_v14 = vrot.slane %v233_v13, 1  ;;  %1446 = vmatpush3.bf16.msra.mxu1 %v1443_v34  ;;  %v726_v34 = vld [vmem:[%s1961_s13 + $0x38] sm:$0xff] }
  0xf6   :  { %1466 = vmatpush3.bf16.msra.mxu0 %v1463_v61  ;;  %1448 = vmatprep.subr.bf16.mxu1 %v1447_v37  ;;  %v1527_v35 = vpack.c.bf16 %v726_v34, %v725_v33 }
  0xf7   :  { %v235_v15 = vadd.f32 %v234_v14, %v233_v13  ;;  %1468 = vmatprep.subr.bf16.mxu0 %v1467_v0  ;;  %v734_v13 = vld [vmem:[%s1962_s14 + $0x38] sm:$0xff] }
  0xf8   :  { %v1511_v14 = vpack.c.bf16 %v734_v13, %v733_v11 }
  0xf9   :  { %v308_v16 = vadd.f32 %v1260_v46, %v235_v15  ;;  %v303_v17 = vadd.f32 %v302_v52, %v235_v15  ;;  %1450 = vmatpush3.bf16.msra.mxu1 %v1447_v37  ;;  %v533_v46 = vld [vmem:[%s1959_s11] sm:$0xff]  ;;  %v631_v52 = vld [vmem:[%s1960_s12 + $0x10] sm:$0xff] }
  0xfa   :  { %1470 = vmatpush3.bf16.msra.mxu0 %v1467_v0  ;;  %1331 = vmatprep.subr.mxu1 %v533_v46  ;;  %v1487_v55 = vpack.c.bf16 %v632_v53, %v631_v52  ;;  %v719_v15 = vld [vmem:[%s1961_s13] sm:$0xff] }
  0xfb   :  { %v314_v18 = vmul.f32 0.2, %v308_v16  ;;  %v313_v19 = vmul.f32 0.2, %v303_v17  ;;  %1472 = vmatprep.subr.bf16.mxu0 %v1471_v1  ;;  %vm311_vm1 = vcmp.ge.f32.partialorder %v303_v17, 0.0  ;;  %vm312_vm2 = vcmp.ge.f32.partialorder %v308_v16, 0.0 }
  0xfc   :  { %v810_v37 = vld [vmem:[%s1952_s4] sm:$0xff] }
  0xfd   :  { %v315_v21 = vsel %vm311_vm1, %v303_v17, %v313_v19  ;;  %v316_v23 = vsel %vm312_vm2, %v308_v16, %v314_v18  ;;  %v720_v16 = vld [vmem:[%s1961_s13 + $0x8] sm:$0xff]  ;;  %v1138_v19 = vld [vmem:[%s1956_s8] ss:$0 sm:$0xff] }
  0xfe   :  { %1474 = vmatpush3.bf16.msra.mxu0 %v1471_v1  ;;  %v319_v22 = vadd.f32 %v317_v20, %v315_v21  ;;  %v320_v25 = vadd.f32 %v318_v24, %v316_v23  ;;  %v1503_v1 = vpack.c.bf16 %v730_v63, %v729_v62  ;;  %v1515_v17 = vpack.c.bf16 %v720_v16, %v719_v15  ;;  %v905_v63 = vld [vmem:[%s1975_s0 + $0x8] sm:$0xff] }
  0xff   :  { %1476 = vmatprep.subr.bf16.mxu0 %v1475_v8  ;;  %v1023_v15 = vld [vmem:[%s1964_s16 + $0x8] sm:$0xff] }
 0x100   :  { %321 = vmax.xlane.f32.xlu0 %v319_v22 }
 0x102   :  { %1478 = vmatpush3.bf16.msra.mxu0 %v1475_v8  ;;  %v1507_v8 = vpack.c.bf16 %v732_v7, %v731_v6 }
 0x103   :  { %1480 = vmatprep.subr.bf16.mxu0 %v1479_v9 }
 0x104   :  { %323 = vmax.xlane.f32.xlu0 %v320_v25 }
 0x106   :  { %1482 = vmatpush3.bf16.msra.mxu0 %v1479_v9  ;;  %v635_v9 = vld [vmem:[%s1960_s12 + $0x30] sm:$0xff] }
 0x107   :  { %1484 = vmatprep.subr.bf16.mxu0 %v1483_v50  ;;  %v1495_v12 = vpack.c.bf16 %v636_v10, %v635_v9 }
 0x18d   :  { %v322_v38 = vpop.xlane.xlu0 %321 }
 0x18e   :  { %v325_v39 = vsub.f32 %v319_v22, %v322_v38 }
 0x190   :  { %v327_v40 = vmul.f32 1.442695, %v325_v39 }
 0x191   :  { %v324_v41 = vpop.xlane.xlu0 %323 }
 0x192   :  { %1542 = vpow2.f32 %v327_v40  ;;  %v326_v42 = vsub.f32 %v320_v25, %v324_v41  ;;  %v721_v25 = vld [vmem:[%s1961_s13 + $0x10] sm:$0xff] }
 0x193   :  { %v1519_v29 = vpack.c.bf16 %v722_v26, %v721_v25  ;;  %v1147_v25 = vld [vmem:[%s1963_s15] ss:$0 sm:$0xff]  ;;  %s1558_s15 = scalar_lea.vmem %s1120_s23, 256 }
 0x194   :  { %v329_v43 = vmul.f32 1.442695, %v326_v42  ;;  %p1559_p0 = scmp.ne.s32.totalorder %s1120_s23, %s1558_s15  ;;  %p1564_p2 = scmp.lt.s32.totalorder %s1558_s15, %s1558_s15 }
 0x196   :  { %1544 = vpow2.f32 %v329_v43  ;;  %p1565_p3 = por %p1564_p2, %p1563_p1 }
 0x198   :  { %p1566_p4 = pnand %p1565_p3, %p1559_p0 }
 0x19c   :  { %v1543_v44 = vpop.eup %1542 }
 0x19d   :  { %1293 = vmatprep.mubr.f32.mxu1 %v1543_v44  ;;  %1328 = vmatprep.mubr.f32.mxu0 %v1543_v44 }
 0x1a0   :  { %v1545_v45 = vpop.eup %1544 }
 0x1a1   :  { %1294 = vmatmul.mubr.f32.vlgmr.msra.gmra.mrb[4].mxu1 %v1545_v45  ;;  %1329 = vmatmul.mubr.f32.vlgmr.msra.gmra.mrb[2].mxu0 %v1545_v45 }
 0x1a2   :  { %1332 = vmatpush3.msra.mxu1 %v533_v46  ;;  %1486 = vmatpush3.bf16.msra.mxu0 %v1483_v50 }
 0x1a3   :  { %1500 = vmatprep.subr.bf16.mxu1 %v1499_v54  ;;  %1488 = vmatprep.subr.bf16.mxu0 %v1487_v55 }
 0x1a6   :  { %1490 = vmatpush3.bf16.msra.mxu0 %v1487_v55 }
 0x1a7   :  { %1492 = vmatprep.subr.bf16.mxu0 %v1491_v5 }
 0x1aa   :  { %1494 = vmatpush3.bf16.msra.mxu0 %v1491_v5 }
 0x1ab   :  { %1496 = vmatprep.subr.bf16.mxu0 %v1495_v12 }
 0x1ae   :  { %1498 = vmatpush3.bf16.msra.mxu0 %v1495_v12 }
 0x1af   :  { %1516 = vmatprep.subr.bf16.mxu0 %v1515_v17 }
 0x274   :  { %v1295_v56 = vpop.f32.mrb[4].mxu1  ;;  %v1330_v57 = vpop.f32.mrb[2].mxu0 }
 0x275   :  { %v423_v58 = vmax.f32 %v1295_v56, 1e-30  ;;  %v413_v59 = vpop.f32.mrb[5].mxu1  ;;  %v524_v60 = vpop.f32.mrb[3].mxu0 }
 0x276   :  { %v422_v61 = vmax.f32 %v413_v59, 1e-30 }
 0x278   :  { %1546 = vrcp.f32 %v422_v61 }
 0x279   :  { %1548 = vrcp.f32 %v423_v58  ;;  %v904_v58 = vld [vmem:[%s1975_s0] sm:$0xff] }
 0x282   :  { %v1547_v0 = vpop.eup %1546 }
 0x283   :  { %v1549_v2 = vpop.eup %1548  ;;  %1333 = vmatprep.mubr.msk.f32.mxu1 %vm534_vm3, %v1547_v0 }
 0x284   :  { %1334 = vmatmul.mubr.msk.f32.vlgmr.msra.gmra.mrb[6].mxu1 %vm534_vm3, %v1549_v2 }
 0x285   :  { %1502 = vmatpush3.bf16.msra.mxu1 %v1499_v54 }
 0x286   :  { %1504 = vmatprep.subr.bf16.mxu1 %v1503_v1 }
 0x289   :  { %1506 = vmatpush3.bf16.msra.mxu1 %v1503_v1 }
 0x28a   :  { %1508 = vmatprep.subr.bf16.mxu1 %v1507_v8 }
 0x28d   :  { %1510 = vmatpush3.bf16.msra.mxu1 %v1507_v8 }
 0x28e   :  { %1512 = vmatprep.subr.bf16.mxu1 %v1511_v14 }
 0x291   :  { %1514 = vmatpush3.bf16.msra.mxu1 %v1511_v14  ;;  %v1022_v14 = vld [vmem:[%s1964_s16] sm:$0xff] }
 0x292   :  { %v1535_v16 = vpack.c.bf16 %v1023_v15, %v1022_v14 }
 0x357   :  { %v1335_v18 = vpop.f32.mrb[6].mxu1 }
 0x358   :  { %v617_v20 = vmul.f32 %v1335_v18, %v1330_v57  ;;  %v607_v21 = vpop.f32.mrb[7].mxu1 }
 0x359   :  { %v616_v22 = vmul.f32 %v607_v21, %v524_v60 }
 0x35a   :  { %v626_v23 = vadd.f32 %v1138_v19, %v617_v20 }
 0x35b   :  { %v625_v24 = vadd.f32 %v1138_v19, %v616_v22 }
 0x35c   :  { %v628_v28 = vmax.f32 %v626_v23, 0.0 }
 0x35d   :  { %v627_v27 = vmax.f32 %v625_v24, 0.0 }
 0x35f   :  { %1352 = vmatprep.mubr.msk.f32.mxu0 %vm637_vm4, %v627_v27  ;;  %1371 = vmatprep.mubr.msk.f32.mxu1 %vm637_vm4, %v627_v27 }
 0x360   :  { %1353 = vmatmul.mubr.msk.f32.vlgmr.msra.gmra.mrb[4].mxu0 %vm637_vm4, %v628_v28  ;;  %1372 = vmatmul.mubr.msk.f32.vlgmr.msra.gmra.mrb[8].mxu1 %vm637_vm4, %v628_v28 }
 0x361   :  { %1518 = vmatpush3.bf16.msra.mxu0 %v1515_v17  ;;  %1390 = vmatprep.mubr.msk.f32.mxu0 %vm637_vm4, %v627_v27 }
 0x362   :  { %1520 = vmatprep.subr.bf16.mxu0 %v1519_v29 }
 0x365   :  { %1522 = vmatpush3.bf16.msra.mxu0 %v1519_v29 }
 0x366   :  { %1524 = vmatprep.subr.bf16.mxu0 %v1523_v32 }
 0x369   :  { %1526 = vmatpush3.bf16.msra.mxu0 %v1523_v32 }
 0x36a   :  { %1528 = vmatprep.subr.bf16.mxu0 %v1527_v35 }
 0x36d   :  { %1530 = vmatpush3.bf16.msra.mxu0 %v1527_v35 }
 0x370   :  { %1391 = vmatmul.mubr.msk.f32.vlgmr.msra.gmra.mrb[6].mxu0 %vm637_vm4, %v628_v28 }
 0x433   :  { %v1354_v38 = vpop.f32.mrb[4].mxu0  ;;  %v1373_v39 = vpop.f32.mrb[8].mxu1 }
 0x434   :  { %v813_v40 = vmul.f32 %v1373_v39, %v811_v36  ;;  %v710_v41 = vpop.f32.mrb[5].mxu0  ;;  %v801_v42 = vpop.f32.mrb[9].mxu1 }
 0x435   :  { %v1531_v43 = vpack.c.bf16 %v1354_v38, %v710_v41  ;;  %v812_v44 = vmul.f32 %v810_v37, %v801_v42 }
 0x436   :  { %v815_v45 = vsel %vm64_vm0, %v813_v40, 0.0 }
 0x437   :  { %v814_v46 = vsel %vm64_vm0, %v812_v44, 0.0  ;;  %1532 = vmatprep.subr.bf16.mxu1 %v1531_v43 }
 0x438   :  { %v816_v47 = vadd.f32 %v815_v45, %v814_v46  ;;  %1534 = vmatpush3.bf16.msra.mxu1 %v1531_v43 }
 0x439   :  { %1536 = vmatprep.subr.bf16.mxu1 %v1535_v16 }
 0x43a   :  { %v817_v48 = vrot.slane %v816_v47, 4 }
 0x43c   :  { %v818_v49 = vadd.f32 %v817_v48, %v816_v47 }
 0x43e   :  { %v819_v50 = vrot.slane %v818_v49, 2 }
 0x440   :  { %v820_v51 = vadd.f32 %v819_v50, %v818_v49 }
 0x442   :  { %v821_v52 = vrot.slane %v820_v51, 1 }
 0x443   :  { %v1392_v53 = vpop.f32.mrb[6].mxu0 }
 0x444   :  { %v822_v54 = vadd.f32 %v821_v52, %v820_v51  ;;  %v889_v55 = vpop.f32.mrb[7].mxu0 }
 0x446   :  { %v895_v56 = vadd.f32 %v1392_v53, %v822_v54  ;;  %v890_v57 = vadd.f32 %v889_v55, %v822_v54 }
 0x448   :  { %vm899_vm5 = vcmp.ge.f32.partialorder %v895_v56, 0.0  ;;  %v901_v59 = vmul.f32 0.2, %v895_v56  ;;  %v900_v60 = vmul.f32 0.2, %v890_v57  ;;  %vm898_vm6 = vcmp.ge.f32.partialorder %v890_v57, 0.0 }
 0x44a   :  { %v902_v61 = vsel %vm898_vm6, %v890_v57, %v900_v60  ;;  %v903_v62 = vsel %vm899_vm5, %v895_v56, %v901_v59 }
 0x44b   :  { %v906_v0 = vadd.f32 %v904_v58, %v902_v61  ;;  %v907_v2 = vadd.f32 %v905_v63, %v903_v62 }
 0x44d   :  { %v908_v1 = vsel %vm64_vm0, %v906_v0, -inf  ;;  %v911_v3 = vsel %vm64_vm0, %v907_v2, -inf }
 0x44e   :  { %909 = vmax.xlane.f32.xlu1 %v908_v1 }
 0x452   :  { %912 = vmax.xlane.f32.xlu1 %v911_v3 }
 0x4db   :  { %v910_v4 = vpop.xlane.xlu1 %909 }
 0x4dc   :  { %v914_v5 = vsub.f32 %v906_v0, %v910_v4 }
 0x4de   :  { %v916_v6 = vmul.f32 1.442695, %v914_v5 }
 0x4df   :  { %v913_v7 = vpop.xlane.xlu1 %912 }
 0x4e0   :  { %1550 = vpow2.f32 %v916_v6  ;;  %v915_v8 = vsub.f32 %v907_v2, %v913_v7 }
 0x4e2   :  { %v918_v9 = vmul.f32 1.442695, %v915_v8 }
 0x4e4   :  { %1552 = vpow2.f32 %v918_v9 }
 0x4ea   :  { %v1551_v10 = vpop.eup %1550 }
 0x4eb   :  { %1397 = vmatprep.mubr.msk.f32.mxu1 %vm64_vm0, %v1551_v10  ;;  %v920_v11 = vsel %vm64_vm0, %v1551_v10, 0.0 }
 0x4ec   :  { %921 = vadd.xlane.f32.xlu0 %v920_v11 }
 0x4ee   :  { %v1553_v12 = vpop.eup %1552 }
 0x4ef   :  { %1398 = vmatmul.mubr.msk.f32.vlgmr.msra.gmra.mrb[10].mxu1 %vm64_vm0, %v1553_v12  ;;  %v923_v13 = vsel %vm64_vm0, %v1553_v12, 0.0 }
 0x4f0   :  { %924 = vadd.xlane.f32.xlu1 %v923_v13  ;;  %1538 = vmatpush3.bf16.msra.mxu1 %v1535_v16 }
 0x579   :  { %v922_v18 = vpop.xlane.xlu0 %921 }
 0x57a   :  { %v926_v20 = vmax.f32 %v922_v18, 1e-30 }
 0x57d   :  { %v925_v17 = vpop.xlane.xlu1 %924 }
 0x57e   :  { %v927_v19 = vmax.f32 %v925_v17, 1e-30 }
 0x580   :  { %1554 = vrcp.f32 %v927_v19 }
 0x581   :  { %1556 = vrcp.f32 %v926_v20 }
 0x58a   :  { %v1555_v21 = vpop.eup %1554 }
 0x58b   :  { %v1557_v23 = vpop.eup %1556 }
 0x5c2   :  { %v1399_v22 = vpop.f32.mrb[10].mxu1 }
 0x5c3   :  { %v1012_v24 = vmul.f32 %v1555_v21, %v1399_v22  ;;  %v1002_v26 = vpop.f32.mrb[11].mxu1 }
 0x5c4   :  { %v1011_v27 = vmul.f32 %v1557_v23, %v1002_v26 }
 0x5c5   :  { %v1021_v29 = vadd.f32 %v1147_v25, %v1012_v24 }
 0x5c6   :  { %v1020_v28 = vadd.f32 %v1147_v25, %v1011_v27 }
 0x5c8   :  { %1404 = vmatprep.mubr.msk.f32.mxu1 %vm64_vm0, %v1020_v28 }
 0x5c9   :  { %1405 = vmatmul.mubr.msk.f32.vlgmr.msra.gmra.mrb[12].mxu1 %vm64_vm0, %v1021_v29 }
 0x69c   :  { %v1406_v31 = vpop.f32.mrb[12].mxu1 }
 0x69d   :  { %v1109_v32 = vadd.f32 %v1406_v31, %v1148_v30  ;;  %v1103_v33 = vpop.f32.mrb[13].mxu1 }
 0x69e   :  { %v1104_v34 = vadd.f32 %v1148_v30, %v1103_v33 }
 0x69f   :  { %1113 = vst [vmem:[#allocation2 + $0x8] sm:$0xff] %v1109_v32 }
 0x6a0   :  { %1112 = vst [vmem:[#allocation2] sm:$0xff] %v1104_v34 }
 0x6a1   :  { %1569 = shalt.err (!%p1566_p4)
}
 0x6a2   :  { %s1570_s17 = scalar_lea.hbm %s1966_s18, 256 }
 0x6a3   :  { %p1571_p5 = scmp.ne.s32.totalorder %s1966_s18, %s1570_s17  ;;  %p1574_p6 = scmp.lt.u32.totalorder %s1570_s17, %s1966_s18 }
 0x6a5   :  { %p1576_p7 = pnand %p1574_p6, %p1571_p5 }
 0x6a7   :  { %1579 = shalt.err (!%p1576_p7)
}
 0x6a8   :  { %s1583_s26 = smov 128   ;;  %s1584_s27 = smov 8  }
 0x6a9   :  { %1125 = dma.vmem_to_hbm [thread:$0]  %s1120_s23, 256, %s1966_s18, [#allocation3], %s1583_s26, %s1583_s26, %s1584_s27  }
 0x6aa   :  { %1580 = dma.done.wait [#allocation3], 256  }
 0x6ab   :  { %1581 = vsyncadd [#allocation3], 4294967040 }
 0x6ac   :  { %1129 = vsyncpa [#allocation3], 1 }

</bundles_post_ra>
